<compile_context>
chip_gen: v5e
topology: v5e:2x2
jax: 0.10.0
libtpu: 0.0.40
codegen_flags: <defaults>
</compile_context>

<pallas_src>
import functools

import jax
import jax.numpy as jnp
from jax import lax
from jax.experimental import pallas as pl
from jax.experimental.pallas import tpu as pltpu


def _focal_loss_kernel(logits_ref, target_ref, loss_ref, *, alpha, gamma, eps,
                       onehot_eps, hw_valid, tile_hw, needs_mask):
    # Block shapes: logits/target (1, C, TILE_HW), loss (1, 1, TILE_HW).
    x = logits_ref[0].astype(jnp.float32)   # (C, TILE)
    t = target_ref[0].astype(jnp.float32)   # (C, TILE)
    C = x.shape[0]

    # labels = argmax(target, dim=C) (first max), then one-hot + 1e-6.
    # labels < C <= ignore_index by construction, so label_to_one_hot_label's split back
    # to the first C channels is an identity here.
    iota_c = lax.broadcasted_iota(jnp.int32, (C, 1), 0)            # (C, 1) class ids
    tmax = jnp.max(t, axis=0, keepdims=True)                       # (1, TILE)
    cand = jnp.where(t == tmax, iota_c, jnp.int32(C))              # (C, TILE)
    labels = jnp.min(cand, axis=0, keepdims=True)                  # (1, TILE) first argmax
    onehot = (iota_c == labels).astype(jnp.float32) + onehot_eps   # (C, TILE)

    # softmax over the class (sublane) axis + eps; one exact reciprocal per column.
    m = jnp.max(x, axis=0, keepdims=True)
    e = jnp.exp(x - m)
    inv_denom = pl.reciprocal(jnp.sum(e, axis=0, keepdims=True))   # exact (approx=False)
    p = e * inv_denom + eps

    one_minus_p = 1.0 - p
    g = float(gamma)
    if g == int(g) and 0.0 <= g <= 8.0:
        gi = int(g)
        if gi == 0:
            w = jnp.ones_like(one_minus_p)
        else:
            w = one_minus_p
            for _ in range(gi - 1):
                w = w * one_minus_p
    else:
        w = jnp.power(one_minus_p, g)
    focal = (-alpha) * w * jnp.log(p)

    loss = jnp.sum(onehot * focal, axis=0, keepdims=True)          # (1, TILE)

    if needs_mask:
        lane = lax.broadcasted_iota(jnp.int32, (1, tile_hw), 1)
        col = pl.program_id(1) * tile_hw + lane
        loss = jnp.where(col < hw_valid, loss, 0.0)

    loss_ref[0] = loss


def _choose_tile_hw(HW, C, itemsize, vmem_budget_bytes=12 * 1024 * 1024):
    """Largest lane tile (multiple of 128, <=32K) such that the 2 inputs x 2 pipeline
    buffers of shape (C_padded, TILE) fit in a conservative VMEM budget (v7x-safe)."""
    LANE = 128
    SUBLANE = 8
    c_pad = max(SUBLANE, ((C + SUBLANE - 1) // SUBLANE) * SUBLANE)  # VMEM sublane padding
    hw128 = ((HW + LANE - 1) // LANE) * LANE
    max_by_vmem = vmem_budget_bytes // (2 * 2 * c_pad * itemsize)
    max_by_vmem = max(LANE, (max_by_vmem // LANE) * LANE)
    return int(min(hw128, 32768, max_by_vmem))


def focal_loss_pallas(logits_nchw, target_nchw, *, alpha, gamma=2.0,
                      reduction="mean", eps=1e-8, ignore_index=30):
    N, C, H, W = logits_nchw.shape
    HW = H * W
    # Stream native dtypes (no wrapper-side f32 cast); cast happens in-kernel.
    x = logits_nchw.reshape(N, C, HW)
    t = target_nchw.reshape(N, C, HW)

    itemsize = max(jnp.dtype(x.dtype).itemsize, jnp.dtype(t.dtype).itemsize)
    tile = _choose_tile_hw(HW, C, itemsize)
    n_tiles = pl.cdiv(HW, tile)
    hw_pad = n_tiles * tile
    if hw_pad != HW:
        pad = hw_pad - HW
        x = jnp.pad(x, ((0, 0), (0, 0), (0, pad)))
        t = jnp.pad(t, ((0, 0), (0, 0), (0, pad)))

    kernel = functools.partial(
        _focal_loss_kernel,
        alpha=float(alpha), gamma=float(gamma),
        eps=float(eps), onehot_eps=1e-6,     # 1e-6 hardcoded in label_to_one_hot_label
        hw_valid=HW, tile_hw=tile, needs_mask=(hw_pad != HW),
    )

    loss_map = pl.pallas_call(
        kernel,
        out_shape=jax.ShapeDtypeStruct((N, 1, hw_pad), jnp.float32),
        grid_spec=pltpu.PrefetchScalarGridSpec(
            num_scalar_prefetch=0,
            grid=(N, n_tiles),
            in_specs=[pl.BlockSpec((1, C, tile), lambda i, j: (i, 0, j)),
                      pl.BlockSpec((1, C, tile), lambda i, j: (i, 0, j))],
            out_specs=pl.BlockSpec((1, 1, tile), lambda i, j: (i, 0, j)),
        ),
        compiler_params=pltpu.CompilerParams(
            dimension_semantics=("parallel", "parallel"),   # no carried state -> megacore OK
            vmem_limit_bytes=32 * 1024 * 1024),
    )(x, t)

    if reduction == "none":
        return loss_map.reshape(N, hw_pad)[:, :HW].reshape(N, H, W)
    elif reduction == "mean":
        # Padded lanes are zeroed in-kernel, so a full sum is exact.
        return jnp.sum(loss_map) / jnp.float32(N * HW)
    elif reduction == "sum":
        return jnp.sum(loss_map)
    else:
        raise NotImplementedError(f"Invalid reduction mode: {reduction}")


class FocalLoss:
    """Mirrors the PyTorch focal_loss used inside improvedLoss (forward only)."""

    def __init__(self, alpha, gamma=2.0, reduction="mean", eps=1e-8, ignore_index=30):
        self.alpha = alpha
        self.gamma = gamma
        self.reduction = reduction
        self.eps = eps
        self.ignore_index = ignore_index

    def __call__(self, input, target):
        return focal_loss_pallas(input, target, alpha=self.alpha, gamma=self.gamma,
                                 reduction=self.reduction, eps=self.eps,
                                 ignore_index=self.ignore_index)


def _reference(logits, target, alpha, gamma, eps, reduction):
    # pure-JAX reference mirroring the torch focal_loss
    p = jax.nn.softmax(logits.astype(jnp.float32), axis=1) + eps
    labels = jnp.argmax(target, axis=1)
    onehot = jax.nn.one_hot(labels, logits.shape[1], dtype=jnp.float32, axis=1) + 1e-6
    focal = -alpha * jnp.power(1.0 - p, gamma) * jnp.log(p)
    loss_tmp = jnp.sum(onehot * focal, axis=1)
    if reduction == "none":
        return loss_tmp
    if reduction == "mean":
        return jnp.mean(loss_tmp)
    return jnp.sum(loss_tmp)


def _one_hot_nchw(labels, C):
    return jnp.transpose(jax.nn.one_hot(labels, C, dtype=jnp.float32), (0, 3, 1, 2))


if __name__ == "__main__":
    key = jax.random.PRNGKey(0)
    k1, k2, k3, k4 = jax.random.split(key, 4)

    # --- main check: improvedLoss's focal term (alpha=0.25, gamma=2.0, mean) ---
    N, C, H, W = 2, 4, 16, 16
    logits = jax.random.normal(k1, (N, C, H, W), dtype=jnp.float32)
    labels = jax.random.randint(k2, (N, H, W), 0, C)
    target = _one_hot_nchw(labels, C)

    criterion = FocalLoss(alpha=0.25, gamma=2.0, reduction="mean", eps=1e-8, ignore_index=30)
    out = jax.block_until_ready(criterion(logits, target))
    ref = _reference(logits, target, alpha=0.25, gamma=2.0, eps=1e-8, reduction="mean")
    assert jnp.allclose(out, ref, rtol=1e-5, atol=1e-6), (out, ref)

    # --- irregular spatial size (exercises lane padding + mask), reduction='none' ---
    N2, C2, H2, W2 = 1, 3, 5, 7
    logits2 = jax.random.normal(k3, (N2, C2, H2, W2), dtype=jnp.float32)
    labels2 = jax.random.randint(k4, (N2, H2, W2), 0, C2)
    target2 = _one_hot_nchw(labels2, C2)

    out2 = jax.block_until_ready(
        focal_loss_pallas(logits2, target2, alpha=0.5, gamma=2.0, reduction="none"))
    ref2 = _reference(logits2, target2, alpha=0.5, gamma=2.0, eps=1e-8, reduction="none")
    assert out2.shape == ref2.shape, (out2.shape, ref2.shape)
    assert jnp.allclose(out2, ref2, rtol=1e-5, atol=1e-6)

    print("KERNEL_OK")
</pallas_src>

<mosaic_0001>
module attributes {stable_mosaic.version = 11 : i64} {
  func.func @_focal_loss_kernel(%arg0: i32, %arg1: i32, %arg2: memref<1x4x256xf32, #tpu.memory_space<vmem>>, %arg3: memref<1x4x256xf32, #tpu.memory_space<vmem>>, %arg4: memref<1x1x256xf32, #tpu.memory_space<vmem>>) attributes {dimension_semantics = [#tpu.dimension_semantics<parallel>, #tpu.dimension_semantics<parallel>], iteration_bounds = array<i64: 2, 1>, scalar_prefetch = 0 : i64, scratch_operands = 0 : i64, tpu.core_type = #tpu.core_type<tc>, window_params = [{transform_indices = @transform_0, window_bounds = array<i64: 1, 4, 256>}, {transform_indices = @transform_1, window_bounds = array<i64: 1, 4, 256>}, {transform_indices = @transform_2, window_bounds = array<i64: 1, 1, 256>}]} {
    %c0 = arith.constant 0 : index
    %c0_0 = arith.constant 0 : index
    %c0_1 = arith.constant 0 : index
    %0 = vector.load %arg2[%c0, %c0_0, %c0_1] : memref<1x4x256xf32, #tpu.memory_space<vmem>>, vector<1x4x256xf32>
    %1 = vector.shape_cast %0 : vector<1x4x256xf32> to vector<4x256xf32>
    %c0_2 = arith.constant 0 : index
    %c0_3 = arith.constant 0 : index
    %c0_4 = arith.constant 0 : index
    %2 = vector.load %arg3[%c0_2, %c0_3, %c0_4] : memref<1x4x256xf32, #tpu.memory_space<vmem>>, vector<1x4x256xf32>
    %3 = vector.shape_cast %2 : vector<1x4x256xf32> to vector<4x256xf32>
    %4 = tpu.iota {dimensions = array<i32: 0>} : vector<4x1xi32>
    %cst = arith.constant dense<0xFF800000> : vector<256xf32>
    %5 = vector.multi_reduction <maximumf>, %3, %cst [0] : vector<4x256xf32> to vector<256xf32>
    %6 = vector.shape_cast %5 : vector<256xf32> to vector<1x256xf32>
    %7 = vector.broadcast %6 : vector<1x256xf32> to vector<4x256xf32>
    %8 = arith.cmpf oeq, %3, %7 : vector<4x256xf32>
    %c4_i32 = arith.constant 4 : i32
    %9 = vector.shape_cast %4 : vector<4x1xi32> to vector<4x1xi32>
    %10 = vector.broadcast %9 : vector<4x1xi32> to vector<4x256xi32>
    %11 = vector.broadcast %c4_i32 : i32 to vector<4x256xi32>
    %12 = arith.select %8, %10, %11 : vector<4x256xi1>, vector<4x256xi32>
    %cst_5 = arith.constant dense<2147483647> : vector<256xi32>
    %13 = vector.multi_reduction <minsi>, %12, %cst_5 [0] : vector<4x256xi32> to vector<256xi32>
    %14 = vector.shape_cast %13 : vector<256xi32> to vector<1x256xi32>
    %15 = vector.broadcast %4 : vector<4x1xi32> to vector<4x256xi32>
    %16 = vector.broadcast %14 : vector<1x256xi32> to vector<4x256xi32>
    %17 = arith.cmpi eq, %15, %16 : vector<4x256xi32>
    %18 = arith.extui %17 : vector<4x256xi1> to vector<4x256xi32>
    %19 = arith.sitofp %18 : vector<4x256xi32> to vector<4x256xf32>
    %cst_6 = arith.constant 9.99999997E-7 : f32
    %20 = vector.broadcast %cst_6 : f32 to vector<4x256xf32>
    %21 = arith.addf %19, %20 : vector<4x256xf32>
    %cst_7 = arith.constant dense<0xFF800000> : vector<256xf32>
    %22 = vector.multi_reduction <maximumf>, %1, %cst_7 [0] : vector<4x256xf32> to vector<256xf32>
    %23 = vector.shape_cast %22 : vector<256xf32> to vector<1x256xf32>
    %24 = vector.broadcast %23 : vector<1x256xf32> to vector<4x256xf32>
    %25 = arith.subf %1, %24 : vector<4x256xf32>
    %26 = math.exp %25 : vector<4x256xf32>
    %cst_8 = arith.constant dense<0.000000e+00> : vector<256xf32>
    %27 = vector.multi_reduction <add>, %26, %cst_8 [0] : vector<4x256xf32> to vector<256xf32>
    %28 = vector.shape_cast %27 : vector<256xf32> to vector<1x256xf32>
    %29 = tpu.reciprocal %28 : vector<1x256xf32> -> vector<1x256xf32>
    %30 = vector.broadcast %29 : vector<1x256xf32> to vector<4x256xf32>
    %31 = arith.mulf %26, %30 : vector<4x256xf32>
    %cst_9 = arith.constant 9.99999993E-9 : f32
    %32 = vector.broadcast %cst_9 : f32 to vector<4x256xf32>
    %33 = arith.addf %31, %32 : vector<4x256xf32>
    %cst_10 = arith.constant 1.000000e+00 : f32
    %34 = vector.broadcast %cst_10 : f32 to vector<4x256xf32>
    %35 = arith.subf %34, %33 : vector<4x256xf32>
    %36 = arith.mulf %35, %35 : vector<4x256xf32>
    %cst_11 = arith.constant -2.500000e-01 : f32
    %37 = vector.broadcast %cst_11 : f32 to vector<4x256xf32>
    %38 = arith.mulf %37, %36 : vector<4x256xf32>
    %39 = math.log %33 : vector<4x256xf32>
    %40 = arith.mulf %38, %39 : vector<4x256xf32>
    %41 = arith.mulf %21, %40 : vector<4x256xf32>
    %cst_12 = arith.constant dense<0.000000e+00> : vector<256xf32>
    %42 = vector.multi_reduction <add>, %41, %cst_12 [0] : vector<4x256xf32> to vector<256xf32>
    %43 = vector.shape_cast %42 : vector<256xf32> to vector<1x256xf32>
    %c0_13 = arith.constant 0 : index
    %c0_14 = arith.constant 0 : index
    %c0_15 = arith.constant 0 : index
    %44 = vector.load %arg4[%c0_13, %c0_14, %c0_15] : memref<1x1x256xf32, #tpu.memory_space<vmem>>, vector<1x1x256xf32>
    %45 = vector.shape_cast %44 : vector<1x1x256xf32> to vector<1x256xf32>
    %46 = vector.shape_cast %43 : vector<1x256xf32> to vector<1x1x256xf32>
    tpu.vector_store %arg4[%c0_13, %c0_14, %c0_15], %46 {strides = array<i32>} : memref<1x1x256xf32, #tpu.memory_space<vmem>>, vector<1x1x256xf32>,
    return
  }
  func.func @transform_0(%arg0: i32, %arg1: i32) -> (i32, i32, i32) {
    %c0_i32 = arith.constant 0 : i32
    %c0_i32_0 = arith.constant 0 : i32
    return %arg0, %c0_i32, %arg1 : i32, i32, i32
  }
  func.func @transform_1(%arg0: i32, %arg1: i32) -> (i32, i32, i32) {
    %c0_i32 = arith.constant 0 : i32
    %c0_i32_0 = arith.constant 0 : i32
    return %arg0, %c0_i32, %arg1 : i32, i32, i32
  }
  func.func @transform_2(%arg0: i32, %arg1: i32) -> (i32, i32, i32) {
    %c0_i32 = arith.constant 0 : i32
    %c0_i32_0 = arith.constant 0 : i32
    return %arg0, %c0_i32, %arg1 : i32, i32, i32
  }
}

</mosaic_0001>

<bundles_post_ra>
// kernel: tpu_custom_call.1
= control target key start
LH: loop header
LB: loop body
LE: loop exit
PB: predicated region body
PF: predicated region fallthrough
CT: control target
= control target key end

     0   :  { %7 = vsyncpa [#allocation3], 0  ;;  %s969_s0 = inlined_call_operand.hbm [shape: f32[2,4,256], index: 0, kind: input, shape index: {}]   ;;  %s970_s1 = inlined_call_operand.hbm [shape: f32[2,4,256], index: 1, kind: input, shape index: {}]   ;;  %s971_s2 = inlined_call_operand.hbm [shape: f32[2,1,256], index: 2, kind: output, shape index: {}]  }
   0x1   :  { %9 = vsyncpa [#allocation3 + $0x1], 0 }
   0x2   :  { %10 = vsyncpa [#allocation6], 0 }
   0x3   :  { %12 = vsyncpa [#allocation6 + $0x1], 0 }
   0x4   :  { %13 = vsyncpa [#allocation4], 0 }
   0x5   :  { %15 = vsyncpa [#allocation4 + $0x1], 0  ;;  %s807_s9 = smov 0   ;;  %s809_s10 = smov 0  }
   0x6   :  { %s811_s11 = smov 0   ;;  %s813_s12 = smov 0  }
   0x7   :  { %s815_s13 = smov 0   ;;  %s817_s14 = smov 0  }
   0x8 LB: > { %s543_s15 = sadd.s32 4294967295, %s788_s14   ;;  %s544_s16 = sadd.s32 4294967294, %s788_s14   ;;  %s788_s14 = sphi %s817_s14, %s21_s14   ;;  %s784_s13 = sphi %s815_s13, %s982_s13   ;;  %s780_s12 = sphi %s813_s12, %s981_s12   ;;  %s776_s11 = sphi %s811_s11, %s980_s11   ;;  %s772_s10 = sphi %s809_s10, %s979_s10   ;;  %s768_s9 = sphi %s807_s9, %s978_s9  }
   0x9   : > { %s33_s17 = sadd.s32 1, %s784_s13  ;;  %s42_s18 = sadd.s32 1, %s776_s11 }
   0xa   : > { %p35_p0 = scmp.ge.s32.totalorder %s33_s17, 2  ;;  %p49_p1 = scmp.ne.s32.totalorder %s776_s11, %s772_s10 }
   0xb   : > { %p50_p2 = scmp.eq.s32.totalorder %s788_s14, 0  ;;  %p55_p3 = scmp.ne.s32.totalorder %s772_s10, %s768_s9 }
   0xc   : > { %s984_s17 = smov (%p35_p0, %s33_s17), 0  ;;  %p56_p5 = scmp.eq.s32.totalorder %s543_s15, 0 }
   0xd   : > { %p848_p4 = por %p50_p2, %p49_p1  ;;  %s37_s20 = ssub.s32 %s784_s13, %s984_s17 }
   0xe   : > { %p109_p6 = scmp.eq.s32.totalorder %s543_s15, 1  ;;  %p40_p7 = scmp.eq.s32.totalorder %s37_s20, 0 }
   0xf   : > { %p854_p8 = por %p56_p5, %p55_p3  ;;  %p115_p10 = scmp.eq.s32.totalorder %s544_s16, 1 }
  0x10   : > { %p858_p9 = por %p109_p6, %p49_p1  ;;  %p546_p12 = scmp.ge.s32.totalorder %s788_s14, 2 }
  0x11   : > { %s863_s23 = scalar_select %p40_p7, %s776_s11, %s42_s18  }
  0x12   : > { %p865_p11 = por %p115_p10, %p55_p3  ;;  %p582_p13 = scmp.lt.s32.totalorder %s788_s14, 2 }
  0x13   : > { %s135_s25 = sand.u32 1, %s776_s11   ;;  %s563_s27 = sshll.u32 %s784_s13, 3 }
  0x14   : > { %s547_s26 = sshll.u32 %s135_s25, 3  ;;  %s146_s30 = scalar_lea.hbm %s969_s0, %s563_s27 }
  0x15   : > { %s139_s3 = scalar_lea.vmem [#allocation2], %s547_s26  ;;  %s148_s5 = sshll.u32 %s146_s30, 4  ;;  %s149_s5 = int_to_ptr.hbm [resolvable:$true] %s148_s5 }
  0x16   : > { %s150_s4 = sshll.u32 %s139_s3, 4  ;;  %p572_p0 = pnand %p582_p13, %p848_p4  ;;  %s151_s4 = int_to_ptr.vmem [resolvable:$true] %s150_s4 }
  0x17   : > { %p553_p1 = scmp.ge.s32.totalorder %s788_s14, 1  ;;  %p177_p2 = scmp.lt.s32.totalorder %s788_s14, 3 }
  0x18   : > { %s136_s6 = scalar_lea.sflag [#allocation3], %s135_s25  ;;  %s168_s15 = scalar_lea.hbm %s970_s1, %s563_s27 }
  0x19   : > { %574 = dma.hbm_to_vmem [thread:$0]  (!%p572_p0), %s149_s5, 128, %s151_s4, %s136_s6  }
  0x1a   : > { %p178_p3 = pnand %p553_p1, %p177_p2  ;;  %s161_s16 = scalar_lea.vmem [#allocation5], %s547_s26 }
  0x1b   : > { %s172_s18 = sshll.u32 %s161_s16, 4  ;;  %s170_s20 = sshll.u32 %s168_s15, 4  ;;  %s173_s18 = int_to_ptr.vmem [resolvable:$true] %s172_s18  ;;  %s171_s20 = int_to_ptr.hbm [resolvable:$true] %s170_s20 }
  0x1c   : > { %s158_s28 = scalar_lea.sflag [#allocation6], %s135_s25  ;;  %181 = sbr.rel (%p178_p3) target bundleno = 192 (0xc0), region = 28 }
  0x1d   : > { %577 = dma.hbm_to_vmem [thread:$0]  (!%p572_p0), %s171_s20, 128, %s173_s18, %s158_s28  }
  0x1e   : > { %s884_s19 = sand.u32 (!%p178_p3), 1, %s772_s10  }
  0x1f   : > { %s554_s29 = sshll.u32 (!%p178_p3), %s884_s19, 3  ;;  %s184_s30 = scalar_lea.sflag (!%p178_p3), [#allocation3], %s884_s19 }
  0x20   : > { %s888_s3 = scalar_lea.vmem (!%p178_p3), [#allocation2], %s554_s29 }
  0x21   : > { %755 = dma.done.wait (%p854_p8), %s184_s30, 128  }
  0x22   : > { %757 = vsyncadd (%p854_p8), %s184_s30, 4294967168  ;;  %s194_s25 = scalar_lea.sflag [#allocation6], %s884_s19  ;;  %s197_s26 = scalar_lea.vmem [#allocation5], %s554_s29 }
  0x23   : > { %759 = dma.done.wait (%p854_p8), %s194_s25, 128  }
  0x24   : > { %761 = vsyncadd (%p854_p8), %s194_s25, 4294967168  ;;  %v228_v0 = vld [vmem:[%s197_s26] sm:$0xff]  ;;  %vm237_vm0 = vcmask 1043456   ;;  %v229_v9 = vlaneseq  ;;  %v790_v12 = vmov 839922192   ;;  %v227_v26 = vld [vmem:[%s888_s3] sm:$0xff] }
  0x25   : > { %232 = vst [vmem:[#allocation1] ss:$2 sm:$0xff] %v228_v0  ;;  %v259_v13 = vunpack.c.l.s4 %v790_v12  ;;  %s556_s21 = sshll.u32 %s884_s19, 1  ;;  %s560_s27 = sshll.u32 %s780_s12, 1 }
  0x26   : > { %v902_v16 = vshrl.u32 %v229_v9, 7  ;;  %s429_s6 = scalar_lea.hbm %s971_s2, %s560_s27  ;;  %s223_s7 = scalar_lea.vmem [#allocation7], %s556_s21 }
  0x27   : > { %v260_v19 = vunpack.c.0.s8 %v259_v13  ;;  %s431_s8 = sshll.u32 %s223_s7, 4  ;;  %s433_s15 = sshll.u32 %s429_s6, 4  ;;  %s432_s8 = int_to_ptr.vmem [resolvable:$true] %s431_s8  ;;  %s434_s15 = int_to_ptr.hbm [resolvable:$true] %s433_s15 }
  0x28   : > { %s417_s12 = scalar_lea.sflag [#allocation4], %s884_s19  ;;  %s716_s16 = sshra.s32 %s434_s15, 4  ;;  %s717_s16 = int_to_ptr.hbm [resolvable:$true] %s716_s16 }
  0x29   : > { %v261_v23 = vperm.slane %v902_v16, %v260_v19  ;;  %s718_s18 = scalar_lea.hbm %s717_s16, 2  ;;  %s722_s29 = scalar_lea.hbm %s971_s2, 4 }
  0x2a   : > { %p719_p4 = scmp.ne.s32.totalorder %s717_s16, %s718_s18  ;;  %p723_p7 = scmp.lt.s32.totalorder %s717_s16, %s971_s2 }
  0x2b   : > { %p724_p8 = scmp.lt.s32.totalorder %s722_s29, %s718_s18 }
  0x2c   : > { %v233_v1 = vld.sshfl [vmem:[#allocation1] sm:$0xff pattern:$0x75316420]  ;;  %v234_v2 = vld.sshfl [vmem:[#allocation1 + $0x8] sm:$0xff pattern:$0x75316420]  ;;  %p720_p5 = pnand %p719_p4, %p858_p9 }
  0x2d   : > { %v238_v3 = vsel %vm237_vm0, %v233_v1, -inf  ;;  %v245_v4 = vsel %vm237_vm0, %v234_v2, -inf  ;;  %p725_p10 = por %p724_p8, %p723_p7 }
  0x2e   : > { %v239_v5 = vrot.slane %v238_v3, 4  ;;  %v246_v6 = vrot.slane %v245_v4, 4  ;;  %p721_p6 = pneg %p720_p5 }
  0x30   : > { %v240_v7 = vmax.f32 %v238_v3, %v239_v5  ;;  %v247_v8 = vmax.f32 %v245_v4, %v246_v6  ;;  %p726_p13 = pnand %p725_p10, %p721_p6 }
  0x32   : > { %v241_v10 = vrot.slane %v240_v7, 2  ;;  %v248_v11 = vrot.slane %v247_v8, 2 }
  0x34   : > { %v242_v14 = vmax.f32 %v240_v7, %v241_v10  ;;  %v249_v15 = vmax.f32 %v247_v8, %v248_v11 }
  0x36   : > { %v243_v17 = vrot.slane %v242_v14, 1  ;;  %v250_v18 = vrot.slane %v249_v15, 1 }
  0x38   : > { %v251_v20 = vmax.f32 %v249_v15, %v250_v18  ;;  %v244_v21 = vmax.f32 %v242_v14, %v243_v17 }
  0x3a   : > { %v254_v22 = vrot.slane %v251_v20, 4 }
  0x3c   : > { %v255_v24 = vsel %vm237_vm0, %v244_v21, %v254_v22 }
  0x3d   : > { %vm257_vm1 = vcmp.eq.f32.partialorder %v228_v0, %v255_v24 }
  0x3e   : > { %v262_v25 = vsel %vm257_vm1, %v261_v23, 4 }
  0x3f   : > { %263 = vst [vmem:[#allocation1] ss:$2 sm:$0xff] %v262_v25 }
  0x46   : > { %v264_v27 = vld.sshfl [vmem:[#allocation1] sm:$0xff pattern:$0x75316420]  ;;  %v265_v28 = vld.sshfl [vmem:[#allocation1 + $0x8] sm:$0xff pattern:$0x75316420] }
  0x47   : > { %295 = vst [vmem:[#allocation1] ss:$2 sm:$0xff] %v227_v26  ;;  %v266_v2 = vsel %vm237_vm0, %v264_v27, 2147483647  ;;  %v276_v3 = vsel %vm237_vm0, %v265_v28, 2147483647 }
  0x48   : > { %v267_v4 = vrot.slane %v266_v2, 4  ;;  %v277_v6 = vrot.slane %v276_v3, 4 }
  0x4a   : > { %vm268_vm2 = vcmp.lt.s32.totalorder %v266_v2, %v267_v4  ;;  %vm278_vm3 = vcmp.lt.s32.totalorder %v276_v3, %v277_v6 }
  0x4b   : > { %v269_v15 = vsel %vm268_vm2, %v266_v2, %v267_v4  ;;  %v279_v19 = vsel %vm278_vm3, %v276_v3, %v277_v6  ;;  %vm413_vm3 = vcmp.lt.s32.totalorder %v229_v9, 256 }
  0x4c   : > { %v270_v25 = vrot.slane %v269_v15, 2  ;;  %v280_v27 = vrot.slane %v279_v19, 2 }
  0x4e   : > { %v296_v29 = vld.sshfl [vmem:[#allocation1] sm:$0xff pattern:$0x75316420]  ;;  %v297_v30 = vld.sshfl [vmem:[#allocation1 + $0x8] sm:$0xff pattern:$0x75316420]  ;;  %vm271_vm12 = vcmp.lt.s32.totalorder %v269_v15, %v270_v25  ;;  %vm281_vm13 = vcmp.lt.s32.totalorder %v279_v19, %v280_v27 }
  0x4f   : > { %v300_v31 = vsel %vm237_vm0, %v296_v29, -inf  ;;  %v307_v32 = vsel %vm237_vm0, %v297_v30, -inf }
  0x50   : > { %v301_v33 = vrot.slane %v300_v31, 4  ;;  %v308_v34 = vrot.slane %v307_v32, 4 }
  0x52   : > { %v302_v35 = vmax.f32 %v300_v31, %v301_v33  ;;  %v309_v36 = vmax.f32 %v307_v32, %v308_v34 }
  0x54   : > { %v303_v37 = vrot.slane %v302_v35, 2  ;;  %v310_v38 = vrot.slane %v309_v36, 2 }
  0x56   : > { %v304_v39 = vmax.f32 %v302_v35, %v303_v37  ;;  %v311_v40 = vmax.f32 %v309_v36, %v310_v38  ;;  %v272_v36 = vsel %vm271_vm12, %v269_v15, %v270_v25  ;;  %v282_v37 = vsel %vm281_vm13, %v279_v19, %v280_v27 }
  0x58   : > { %v305_v41 = vrot.slane %v304_v39, 1  ;;  %v312_v42 = vrot.slane %v311_v40, 1 }
  0x5a   : > { %v313_v43 = vmax.f32 %v311_v40, %v312_v42  ;;  %v306_v44 = vmax.f32 %v304_v39, %v305_v41  ;;  %v273_v40 = vrot.slane %v272_v36, 1  ;;  %v283_v41 = vrot.slane %v282_v37, 1 }
  0x5c   : > { %v316_v45 = vrot.slane %v313_v43, 4  ;;  %vm274_vm14 = vcmp.lt.s32.totalorder %v272_v36, %v273_v40  ;;  %vm284_vm15 = vcmp.lt.s32.totalorder %v282_v37, %v283_v41 }
  0x5e   : > { %v317_v46 = vsel %vm237_vm0, %v306_v44, %v316_v45 }
  0x5f   : > { %v319_v47 = vsub.f32 %v227_v26, %v317_v46  ;;  %v275_v46 = vsel %vm274_vm14, %v272_v36, %v273_v40 }
  0x60   : > { %vm286_vm1 = vcmp.eq.s32.totalorder %v902_v16, %v275_v46 }
  0x61   : > { %v320_v48 = vmul.f32 1.442695, %v319_v47  ;;  %v285_v47 = vsel %vm284_vm15, %v282_v37, %v283_v41 }
  0x62   : > { %vm287_vm2 = vcmp.eq.s32.totalorder %v902_v16, %v285_v47 }
  0x63   : > { %634 = vpow2.f32 %v320_v48 }
  0x69   : > { %v910_v49 = vpop.eup %634 }
  0x6a   : > { %323 = vst [vmem:[#allocation1] ss:$2 sm:$0xff] %v910_v49 }
  0x71   : > { %v324_v50 = vld.sshfl [vmem:[#allocation1] sm:$0xff pattern:$0x75316420]  ;;  %v325_v51 = vld.sshfl [vmem:[#allocation1 + $0x8] sm:$0xff pattern:$0x75316420] }
  0x72   : > { %v328_v52 = vsel %vm237_vm0, %v324_v50, 0.0  ;;  %v335_v53 = vsel %vm237_vm0, %v325_v51, 0.0 }
  0x73   : > { %v329_v54 = vrot.slane %v328_v52, 4  ;;  %v336_v55 = vrot.slane %v335_v53, 4 }
  0x75   : > { %v330_v56 = vadd.f32 %v329_v54, %v328_v52  ;;  %v337_v57 = vadd.f32 %v336_v55, %v335_v53 }
  0x77   : > { %v331_v58 = vrot.slane %v330_v56, 2  ;;  %v338_v59 = vrot.slane %v337_v57, 2 }
  0x79   : > { %v332_v60 = vadd.f32 %v331_v58, %v330_v56  ;;  %v339_v61 = vadd.f32 %v338_v59, %v337_v57 }
  0x7b   : > { %v333_v62 = vrot.slane %v332_v60, 1  ;;  %v340_v63 = vrot.slane %v339_v61, 1 }
  0x7d   : > { %v334_v0 = vadd.f32 %v333_v62, %v332_v60  ;;  %v341_v1 = vadd.f32 %v340_v63, %v339_v61 }
  0x7f   : > { %636 = vrcp.f32 %v334_v0  ;;  %v367_v14 = vand.u32 2147483648, %v341_v1  ;;  %v365_v18 = vand.u32 2147483647, %v341_v1  ;;  %vm347_vm6 = vweird.f32 %v334_v0 }
  0x80   : > { %638 = vrcp.f32 %v341_v1  ;;  %v353_v21 = vand.u32 2147483648, %v334_v0  ;;  %v351_v23 = vand.u32 2147483647, %v334_v0  ;;  %vm361_vm8 = vweird.f32 %v341_v1 }
  0x81   : > { %v368_v26 = vor.u32 1.1754944e-38, %v367_v14  ;;  %vm366_vm10 = vcmp.eq.f32.partialorder %v365_v18, 8.507059e+37 }
  0x82   : > { %v354_v30 = vor.u32 1.1754944e-38, %v353_v21  ;;  %vm352_vm11 = vcmp.eq.f32.partialorder %v351_v23, 8.507059e+37 }
  0x85   : > { %v637_v5 = vpop.eup %636 }
  0x86   : > { %v639_v7 = vpop.eup %638  ;;  %v343_v8 = vmul.f32 %v637_v5, %v334_v0  ;;  %vm348_vm4 = vweird.f32 %v637_v5 }
  0x87   : > { %v357_v10 = vmul.f32 %v639_v7, %v341_v1  ;;  %vm362_vm5 = vweird.f32 %v639_v7  ;;  %vm917_vm7 = vmor %vm347_vm6, %vm348_vm4 }
  0x88   : > { %v344_v11 = vsub.f32 1.0, %v343_v8  ;;  %vm363_vm9 = vmor %vm361_vm8, %vm362_vm5 }
  0x89   : > { %v358_v12 = vsub.f32 1.0, %v357_v10 }
  0x8a   : > { %v345_v13 = vmul.f32 %v637_v5, %v344_v11 }
  0x8b   : > { %v359_v17 = vmul.f32 %v639_v7, %v358_v12 }
  0x8c   : > { %v346_v20 = vadd.f32 %v637_v5, %v345_v13 }
  0x8d   : > { %v360_v24 = vadd.f32 %v639_v7, %v359_v17 }
  0x8e   : > { %v350_v28 = vsel %vm917_vm7, %v637_v5, %v346_v20 }
  0x8f   : > { %v364_v29 = vsel %vm363_vm9, %v639_v7, %v360_v24  ;;  %v355_v33 = vsel %vm352_vm11, %v354_v30, %v350_v28 }
  0x90   : > { %v369_v31 = vsel %vm366_vm10, %v368_v26, %v364_v29 }
  0x91   : > { %v372_v32 = vrot.slane %v369_v31, 4 }
  0x93   : > { %v373_v34 = vsel %vm237_vm0, %v355_v33, %v372_v32 }
  0x94   : > { %v375_v35 = vmul.f32 %v910_v49, %v373_v34  ;;  %v791_v49 = vmov 0.0  }
  0x95   : > { %v557_v50 = vsel %vm286_vm1, 1.0, %v791_v49  ;;  %v558_v51 = vsel %vm287_vm2, 1.0, %v791_v49 }
  0x96   : > { %v376_v38 = vadd.f32 1e-08, %v375_v35  ;;  %v292_v52 = vadd.f32 1e-06, %v557_v50  ;;  %v293_v53 = vadd.f32 1e-06, %v558_v51 }
  0x98   : > { %v377_v39 = vsub.f32 1.0, %v376_v38  ;;  %640 = vlog2.f32 %v376_v38 }
  0x9a   : > { %v378_v42 = vmul.f32 %v377_v39, %v377_v39 }
  0x9c   : > { %v379_v44 = vmul.f32 -0.25, %v378_v42 }
  0x9e   : > { %v641_v43 = vpop.eup %640 }
  0x9f   : > { %v381_v45 = vmul.f32 0.6931472, %v641_v43 }
  0xa1   : > { %v382_v48 = vmul.f32 %v381_v45, %v379_v44 }
  0xa3   : > { %384 = vst [vmem:[#allocation1] ss:$2 sm:$0xff] %v382_v48 }
  0xaa   : > { %v385_v54 = vld.sshfl [vmem:[#allocation1] sm:$0xff pattern:$0x75316420]  ;;  %v386_v55 = vld.sshfl [vmem:[#allocation1 + $0x8] sm:$0xff pattern:$0x75316420] }
  0xab   : > { %v389_v56 = vmul.f32 %v385_v54, %v292_v52  ;;  %v390_v57 = vmul.f32 %v386_v55, %v293_v53 }
  0xad   : > { %v391_v58 = vsel %vm237_vm0, %v389_v56, 0.0  ;;  %v398_v59 = vsel %vm237_vm0, %v390_v57, 0.0  ;;  %vm408_vm0 = vcmask 1040384  }
  0xae   : > { %v392_v60 = vrot.slane %v391_v58, 4  ;;  %v399_v61 = vrot.slane %v398_v59, 4 }
  0xb0   : > { %v393_v62 = vadd.f32 %v392_v60, %v391_v58  ;;  %v400_v63 = vadd.f32 %v399_v61, %v398_v59 }
  0xb2   : > { %v394_v16 = vrot.slane %v393_v62, 2  ;;  %v401_v0 = vrot.slane %v400_v63, 2 }
  0xb4   : > { %v395_v1 = vadd.f32 %v394_v16, %v393_v62  ;;  %v402_v2 = vadd.f32 %v401_v0, %v400_v63 }
  0xb6   : > { %v396_v3 = vrot.slane %v395_v1, 1  ;;  %v403_v4 = vrot.slane %v402_v2, 1 }
  0xb8   : > { %v404_v5 = vadd.f32 %v403_v4, %v402_v2  ;;  %v397_v6 = vadd.f32 %v396_v3, %v395_v1 }
  0xba   : > { %v407_v7 = vrot.slane %v404_v5, 7 }
  0xbc   : > { %v409_v8 = vsel %vm408_vm0, %v397_v6, %v407_v7 }
  0xbd   : > { %415 = vst.msk [vmem:[%s223_s7] sm:$0x3] %vm413_vm3, %v409_v8 }
  0xbe   : > { %729 = shalt.err (!%p726_p13)
}
  0xbf   : > { %569 = dma.vmem_to_hbm [thread:$0]  (%p858_p9), %s432_s8, 32, %s434_s15, %s417_s12  }
  0xc0 PF: > { %s445_s19 = sand.u32 1, %s768_s9   ;;  %p579_p0 = pnand %p546_p12, %p865_p11 }
  0xc1   : > { %s446_s25 = scalar_lea.sflag [#allocation4], %s445_s19 }
  0xc2   : > { %p580_p1 = pneg %p579_p0 }
  0xc4   : > { %763 = dma.done.wait (%p580_p1), %s446_s25, 32  }
  0xc5   : > { %765 = vsyncadd (%p580_p1), %s446_s25, 4294967264  ;;  %s21_s14 = sadd.s32 1, %s788_s14   ;;  %s978_s9 = smov %s772_s10 }
  0xc6   : > { %p18_p2 = scmp.ge.s32.totalorder %s21_s14, 4   ;;  %s979_s10 = smov %s776_s11 }
  0xc7   : > { %s980_s11 = smov %s863_s23  ;;  %s981_s12 = smov %s784_s13 }
  0xc8   : > { %s982_s13 = smov %s984_s17  ;;  %20 = sbr.rel (!%p18_p2) target bundleno = 8 (0x8), region = 86 }
  0xcd   :  { %452 = vsyncpa [#allocation3], 1 }
  0xce   :  { %454 = vsyncpa [#allocation3 + $0x1], 1 }
  0xcf   :  { %455 = vsyncpa [#allocation6], 1 }
  0xd0   :  { %457 = vsyncpa [#allocation6 + $0x1], 1 }
  0xd1   :  { %458 = vsyncpa [#allocation4], 1 }
  0xd2   :  { %460 = vsyncpa [#allocation4 + $0x1], 1 }

</bundles_post_ra>
